<compile_context>
chip_gen: v6e
topology: v6e:2x2x1
jax: 0.10.0
libtpu: 0.0.40
codegen_flags: <defaults>
</compile_context>

<pallas_src>
import functools

import jax
import jax.numpy as jnp
from jax.experimental import pallas as pl


# ----------------------------------------------------------------------------
# Fused kernel: conv(3x3, pad=1) + bias + ReLU + GAP + linear head
# ----------------------------------------------------------------------------
def gradcam_fused_kernel(x_ref, w_ref, cb_ref, pool_ref, hw_ref, fb_ref,
                         feat_ref, out_ref, *, N, H, W, C_in, C_out, KH, Wp):
    # x_ref:    (N, H+KH-1, Wp*C_in)   zero-padded NHWC input, (Wp, C_in) on lanes
    # w_ref:    (KH, Wp*C_in, W*C_out) per-row shifted block-Toeplitz conv weights
    #                                  (all KW lane shifts folded into the matrix)
    # cb_ref:   (1, W*C_out)           conv bias tiled across w positions
    # pool_ref: (N, N*H)               per-batch mean-pool-over-h matrix (1/(H*W))
    # hw_ref:   (W*C_out, NUM_CLASSES) fc weight tiled across w (completes pool over w)
    # fb_ref:   (1, NUM_CLASSES)       fc bias
    # feat_ref: (N*H, W*C_out)         lane-dense ReLU'd conv feature slab (output)
    # out_ref:  (N, NUM_CLASSES)       logits (output)
    x = x_ref[...]                                          # whole padded input in vregs

    # Conv bias folded in by initializing the f32 accumulator with it (hoisted,
    # single broadcast).
    acc = jnp.broadcast_to(cb_ref[...], (N * H, W * C_out)).astype(jnp.float32)

    # KH accumulating MXU matmuls; each uses the full-lane padded-width slab so
    # no lane slicing is needed — only a static sublane (row) slice per tap row.
    for ki in range(KH):
        slab = x[:, ki:ki + H, :].reshape(N * H, Wp * C_in)   # (N*H, Wp*C_in)
        acc = acc + jnp.dot(slab, w_ref[ki],
                            preferred_element_type=jnp.float32)

    feat = jnp.maximum(acc, 0.0)                            # ReLU, (N*H, W*C_out)
    feat_ref[...] = feat.astype(feat_ref.dtype)             # unmasked (32,128) store

    # Global-average-pool + linear head as two small MXU matmuls
    # (no masked cross-sublane XLU reduce).
    pooled = jnp.dot(pool_ref[...], feat,
                     preferred_element_type=jnp.float32)    # (N, W*C_out)
    logits = jnp.dot(pooled, hw_ref[...],
                     preferred_element_type=jnp.float32)    # (N, NUM_CLASSES)
    out_ref[...] = logits + fb_ref[...]


# ----------------------------------------------------------------------------
# Wrapper: layout plumbing only (tiny XLA ops, no 9x patch materialization)
# ----------------------------------------------------------------------------
def gradcam_hook_forward(x_nchw, conv_w, conv_b, fc_w, fc_b):
    """Returns (logits, conv_features_nhwc).

    The NHWC feature map stands in for the `conv_feature.set_features(out)`
    side effect (kept channels-last — the TPU-friendly layout for the eventual
    GradCAM gradient math; transpose outside if NCHW is strictly required).
    """
    N, C_in, H, W = x_nchw.shape
    C_out = conv_w.shape[0]
    KH, KW = conv_w.shape[2], conv_w.shape[3]
    num_classes = fc_w.shape[0]
    pad = (KH - 1) // 2
    Hp, Wp = H + KH - 1, W + KW - 1

    f32 = jnp.float32

    # Padded NHWC input with (Wp, C_in) flattened onto the lane axis.
    x_nhwc = x_nchw.transpose(0, 2, 3, 1)
    x_pad = jnp.pad(x_nhwc, ((0, 0), (pad, pad), (pad, pad), (0, 0)))
    x_flat = x_pad.reshape(N, Hp, Wp * C_in)                         # (N, Hp, Wp*C_in)

    # Per-kernel-row weights with ALL width (kj) shifts folded in:
    #   w_big[ki, p*C_in+ci, w*C_out+co] = sum_kj conv_w[co,ci,ki,kj] * [p == w+kj]
    conv_w_t = conv_w.transpose(2, 3, 1, 0).astype(f32)              # (KH, KW, C_in, C_out)
    shift_sel = (jnp.arange(Wp)[None, :, None]
                 == (jnp.arange(W)[None, None, :]
                     + jnp.arange(KW)[:, None, None])).astype(f32)   # (KW, Wp, W)
    w_big = jnp.einsum("jpw,kjic->kpiwc", shift_sel, conv_w_t).reshape(
        KH, Wp * C_in, W * C_out)                                    # (KH, Wp*C_in, W*C_out)

    cb_row = jnp.tile(conv_b.astype(f32), W).reshape(1, W * C_out)   # (1, W*C_out)

    # Mean-pool over h per batch (scaled by 1/(H*W)); pooling over w is folded
    # into the W-tiled fc weight below.
    pool_mat = (jnp.arange(N)[:, None] == (jnp.arange(N * H)[None, :] // H)
                ).astype(f32) / float(H * W)                         # (N, N*H)
    head_w = jnp.tile(fc_w.T.astype(f32), (W, 1))                    # (W*C_out, classes)
    fc_b_2d = fc_b.astype(f32).reshape(1, num_classes)

    kernel = functools.partial(gradcam_fused_kernel, N=N, H=H, W=W,
                               C_in=C_in, C_out=C_out, KH=KH, Wp=Wp)

    feat_slab, logits = pl.pallas_call(
        kernel,
        out_shape=(
            jax.ShapeDtypeStruct((N * H, W * C_out), f32),   # lane-dense feature slab
            jax.ShapeDtypeStruct((N, num_classes), f32),     # logits
        ),
        in_specs=[
            pl.BlockSpec((N, Hp, Wp * C_in), lambda: (0, 0, 0)),
            pl.BlockSpec((KH, Wp * C_in, W * C_out), lambda: (0, 0, 0)),
            pl.BlockSpec((1, W * C_out), lambda: (0, 0)),
            pl.BlockSpec((N, N * H), lambda: (0, 0)),
            pl.BlockSpec((W * C_out, num_classes), lambda: (0, 0)),
            pl.BlockSpec((1, num_classes), lambda: (0, 0)),
        ],
        out_specs=(
            pl.BlockSpec((N * H, W * C_out), lambda: (0, 0)),
            pl.BlockSpec((N, num_classes), lambda: (0, 0)),
        ),
    )(x_flat, w_big, cb_row, pool_mat, head_w, fc_b_2d)

    # (N*H, W*C_out) -> (N, H, W, C_out): pure row-major reshape, no transpose.
    feat_nhwc = feat_slab.reshape(N, H, W, C_out)

    # TODO(synk): out.register_hook(grad_extractor) is a backward-pass gradient
    # capture with no forward compute; not representable in a forward kernel.
    return logits, feat_nhwc


if __name__ == "__main__":
    key = jax.random.PRNGKey(0)
    k_x, k_cw, k_cb, k_fw, k_fb = jax.random.split(key, 5)

    N, C_in, H, W = 2, 4, 16, 16
    C_out, num_classes = 8, 10

    x = jax.random.normal(k_x, (N, C_in, H, W), dtype=jnp.float32)
    conv_w = jax.random.normal(k_cw, (C_out, C_in, 3, 3), dtype=jnp.float32) * 0.1
    conv_b = jax.random.normal(k_cb, (C_out,), dtype=jnp.float32) * 0.1
    fc_w = jax.random.normal(k_fw, (num_classes, C_out), dtype=jnp.float32) * 0.1
    fc_b = jax.random.normal(k_fb, (num_classes,), dtype=jnp.float32) * 0.1

    logits, feats = jax.jit(gradcam_hook_forward)(x, conv_w, conv_b, fc_w, fc_b)
    jax.block_until_ready(logits)
    jax.block_until_ready(feats)

    # Pure-JAX reference (independent path: lax.conv, full precision).
    feat_ref = jax.lax.conv_general_dilated(
        x, conv_w, window_strides=(1, 1), padding="SAME",
        dimension_numbers=("NCHW", "OIHW", "NCHW"),
        precision=jax.lax.Precision.HIGHEST) + conv_b[None, :, None, None]
    feat_ref = jnp.maximum(feat_ref, 0.0)                       # (N, C_out, H, W)
    pooled_ref = feat_ref.mean(axis=(2, 3))                     # (N, C_out)
    logits_ref = jnp.dot(pooled_ref, fc_w.T,
                         precision=jax.lax.Precision.HIGHEST) + fc_b[None, :]

    assert jnp.allclose(feats, feat_ref.transpose(0, 2, 3, 1), atol=1e-4, rtol=1e-4)
    assert jnp.allclose(logits, logits_ref, atol=1e-4, rtol=1e-4)
    assert logits.shape == (N, num_classes)
    assert feats.shape == (N, H, W, C_out)

    print("KERNEL_OK")
</pallas_src>

<mosaic_0001>
module attributes {stable_mosaic.version = 11 : i64} {
  func.func @gradcam_fused_kernel(%arg0: memref<2x18x72xf32, #tpu.memory_space<vmem>>, %arg1: memref<3x72x128xf32, #tpu.memory_space<vmem>>, %arg2: memref<1x128xf32, #tpu.memory_space<vmem>>, %arg3: memref<2x32xf32, #tpu.memory_space<vmem>>, %arg4: memref<128x10xf32, #tpu.memory_space<vmem>>, %arg5: memref<1x10xf32, #tpu.memory_space<vmem>>, %arg6: memref<32x128xf32, #tpu.memory_space<vmem>>, %arg7: memref<2x10xf32, #tpu.memory_space<vmem>>) attributes {dimension_semantics = [], scalar_prefetch = 0 : i64, scratch_operands = 0 : i64, tpu.core_type = #tpu.core_type<tc>} {
    %c0 = arith.constant 0 : index
    %c0_0 = arith.constant 0 : index
    %c0_1 = arith.constant 0 : index
    %0 = vector.load %arg0[%c0, %c0_0, %c0_1] : memref<2x18x72xf32, #tpu.memory_space<vmem>>, vector<2x18x72xf32>
    %c0_2 = arith.constant 0 : index
    %c0_3 = arith.constant 0 : index
    %1 = vector.load %arg2[%c0_2, %c0_3] : memref<1x128xf32, #tpu.memory_space<vmem>>, vector<1x128xf32>
    %2 = vector.shape_cast %1 : vector<1x128xf32> to vector<1x128xf32>
    %3 = vector.broadcast %2 : vector<1x128xf32> to vector<32x128xf32>
    %4 = vector.extract_strided_slice %0 {offsets = [0, 0, 0], sizes = [2, 16, 72], strides = [1, 1, 1]} : vector<2x18x72xf32> to vector<2x16x72xf32>
    %5 = vector.shape_cast %4 : vector<2x16x72xf32> to vector<32x72xf32>
    %c0_4 = arith.constant 0 : index
    %c0_5 = arith.constant 0 : index
    %c0_6 = arith.constant 0 : index
    %6 = vector.load %arg1[%c0_4, %c0_5, %c0_6] : memref<3x72x128xf32, #tpu.memory_space<vmem>>, vector<1x72x128xf32>
    %7 = vector.shape_cast %6 : vector<1x72x128xf32> to vector<72x128xf32>
    %cst = arith.constant dense<0.000000e+00> : vector<32x128xf32>
    %8 = tpu.matmul %5, %7, %cst {dimension_numbers = #tpu.dot_dimension_numbers<[1], [0], [0], [1], [0, 0, 1, 1], [], []>} : vector<32x72xf32>, vector<72x128xf32>, vector<32x128xf32> -> vector<32x128xf32>
    %9 = arith.addf %3, %8 : vector<32x128xf32>
    %10 = vector.extract_strided_slice %0 {offsets = [0, 1, 0], sizes = [2, 16, 72], strides = [1, 1, 1]} : vector<2x18x72xf32> to vector<2x16x72xf32>
    %11 = vector.shape_cast %10 : vector<2x16x72xf32> to vector<32x72xf32>
    %c1 = arith.constant 1 : index
    %c0_7 = arith.constant 0 : index
    %c0_8 = arith.constant 0 : index
    %12 = vector.load %arg1[%c1, %c0_7, %c0_8] : memref<3x72x128xf32, #tpu.memory_space<vmem>>, vector<1x72x128xf32>
    %13 = vector.shape_cast %12 : vector<1x72x128xf32> to vector<72x128xf32>
    %cst_9 = arith.constant dense<0.000000e+00> : vector<32x128xf32>
    %14 = tpu.matmul %11, %13, %cst_9 {dimension_numbers = #tpu.dot_dimension_numbers<[1], [0], [0], [1], [0, 0, 1, 1], [], []>} : vector<32x72xf32>, vector<72x128xf32>, vector<32x128xf32> -> vector<32x128xf32>
    %15 = arith.addf %9, %14 : vector<32x128xf32>
    %16 = vector.extract_strided_slice %0 {offsets = [0, 2, 0], sizes = [2, 16, 72], strides = [1, 1, 1]} : vector<2x18x72xf32> to vector<2x16x72xf32>
    %17 = vector.shape_cast %16 : vector<2x16x72xf32> to vector<32x72xf32>
    %c2 = arith.constant 2 : index
    %c0_10 = arith.constant 0 : index
    %c0_11 = arith.constant 0 : index
    %18 = vector.load %arg1[%c2, %c0_10, %c0_11] : memref<3x72x128xf32, #tpu.memory_space<vmem>>, vector<1x72x128xf32>
    %19 = vector.shape_cast %18 : vector<1x72x128xf32> to vector<72x128xf32>
    %cst_12 = arith.constant dense<0.000000e+00> : vector<32x128xf32>
    %20 = tpu.matmul %17, %19, %cst_12 {dimension_numbers = #tpu.dot_dimension_numbers<[1], [0], [0], [1], [0, 0, 1, 1], [], []>} : vector<32x72xf32>, vector<72x128xf32>, vector<32x128xf32> -> vector<32x128xf32>
    %21 = arith.addf %15, %20 : vector<32x128xf32>
    %cst_13 = arith.constant 0.000000e+00 : f32
    %22 = vector.broadcast %cst_13 : f32 to vector<32x128xf32>
    %23 = arith.maximumf %21, %22 : vector<32x128xf32>
    %c0_14 = arith.constant 0 : index
    %c0_15 = arith.constant 0 : index
    %24 = vector.load %arg6[%c0_14, %c0_15] : memref<32x128xf32, #tpu.memory_space<vmem>>, vector<32x128xf32>
    tpu.vector_store %arg6[%c0_14, %c0_15], %23 {strides = array<i32>} : memref<32x128xf32, #tpu.memory_space<vmem>>, vector<32x128xf32>,
    %c0_16 = arith.constant 0 : index
    %c0_17 = arith.constant 0 : index
    %25 = vector.load %arg3[%c0_16, %c0_17] : memref<2x32xf32, #tpu.memory_space<vmem>>, vector<2x32xf32>
    %cst_18 = arith.constant dense<0.000000e+00> : vector<2x128xf32>
    %26 = tpu.matmul %25, %23, %cst_18 {dimension_numbers = #tpu.dot_dimension_numbers<[1], [0], [0], [1], [0, 0, 1, 1], [], []>} : vector<2x32xf32>, vector<32x128xf32>, vector<2x128xf32> -> vector<2x128xf32>
    %c0_19 = arith.constant 0 : index
    %c0_20 = arith.constant 0 : index
    %27 = vector.load %arg4[%c0_19, %c0_20] : memref<128x10xf32, #tpu.memory_space<vmem>>, vector<128x10xf32>
    %cst_21 = arith.constant dense<0.000000e+00> : vector<2x10xf32>
    %28 = tpu.matmul %26, %27, %cst_21 {dimension_numbers = #tpu.dot_dimension_numbers<[1], [0], [0], [1], [0, 0, 1, 1], [], []>} : vector<2x128xf32>, vector<128x10xf32>, vector<2x10xf32> -> vector<2x10xf32>
    %c0_22 = arith.constant 0 : index
    %c0_23 = arith.constant 0 : index
    %29 = vector.load %arg5[%c0_22, %c0_23] : memref<1x10xf32, #tpu.memory_space<vmem>>, vector<1x10xf32>
    %30 = vector.broadcast %29 : vector<1x10xf32> to vector<2x10xf32>
    %31 = arith.addf %28, %30 : vector<2x10xf32>
    %c0_24 = arith.constant 0 : index
    %c0_25 = arith.constant 0 : index
    %32 = vector.load %arg7[%c0_24, %c0_25] : memref<2x10xf32, #tpu.memory_space<vmem>>, vector<2x10xf32>
    tpu.vector_store %arg7[%c0_24, %c0_25], %31 {strides = array<i32>} : memref<2x10xf32, #tpu.memory_space<vmem>>, vector<2x10xf32>,
    return
  }
}

</mosaic_0001>

<bundles_post_ra>
// kernel: tile.13
= control target key start
LH: loop header
LB: loop body
LE: loop exit
PB: predicated region body
PF: predicated region fallthrough
CT: control target
= control target key end

     0   :  { %s28_s0 = inlined_call_operand.vmem [shape: f32[8], index: 0, kind: input, shape index: {}]   ;;  %s29_s1 = inlined_call_operand.vmem [shape: f32[16,8], index: 1, kind: output, shape index: {}]  }
   0x1   :  { %v4_v0 = vld [vmem:[%s28_s0] ss:$0 sm:$0xff] }
   0x2   :  { %5 = vst [vmem:[%s29_s1] sm:$0xff] %v4_v0  ;;  %8 = vst [vmem:[%s29_s1 + $0x8] sm:$0xff] %v4_v0 }

// kernel: tile.14
= control target key start
LH: loop header
LB: loop body
LE: loop exit
PB: predicated region body
PF: predicated region fallthrough
CT: control target
= control target key end

     0   :  { %s133_s10 = smov 120   ;;  %s134_s11 = smov 104   ;;  %vm3_vm0 = vcmask 64512   ;;  %vm9_vm1 = vcmask 1048512   ;;  %vm15_vm2 = vcmask 982912   ;;  %vm21_vm3 = vcmask 917312   ;;  %s209_s0 = inlined_call_operand.vmem [shape: f32[16,8], index: 0, kind: input, shape index: {}]   ;;  %s210_s1 = inlined_call_operand.vmem [shape: f32[1,128], index: 1, kind: output, shape index: {}]  }
   0x1   :  { %v103_v0 = vld [vmem:[%s209_s0 + $0xf] sm:$0x1]   ;;  %v105_v1 = vld [vmem:[%s209_s0 + $0xd] sm:$0x1]   ;;  %v104_v2 = vld [vmem:[%s209_s0 + $0xe] sm:$0x1]  }
   0x2   :  { %7 = vrot.lane.b32.xlu0 %v103_v0, %s133_s10  ;;  %19 = vrot.lane.b32.xlu1 %v105_v1, %s134_s11  ;;  %v106_v3 = vld [vmem:[%s209_s0 + $0xc] sm:$0x1]   ;;  %s135_s16 = smov 112   ;;  %s136_s17 = smov 96   ;;  %v107_v4 = vld [vmem:[%s209_s0 + $0xb] sm:$0x1]  }
   0x3   :  { %v108_v5 = vld [vmem:[%s209_s0 + $0xa] sm:$0x1]   ;;  %v2_v6 = vld [vmem:[%s209_s0] sm:$0x1]   ;;  %s137_s24 = smov 88   ;;  %s138_s25 = smov 80  }
   0x4   :  { %4 = vst.msk [vmem:[#allocation0] sm:$0x1] %vm3_vm0, %v2_v6   ;;  %v109_v7 = vld [vmem:[%s209_s0 + $0x9] sm:$0x1]   ;;  %v110_v8 = vld [vmem:[%s209_s0 + $0x8] sm:$0x1]  }
   0x5   :  { %s139_s30 = smov 72   ;;  %s140_s2 = smov 64   ;;  %v111_v9 = vld [vmem:[%s209_s0 + $0x7] sm:$0x1]   ;;  %v112_v10 = vld [vmem:[%s209_s0 + $0x6] sm:$0x1]  }
   0x6   :  { %13 = vrot.lane.b32.xlu0 %v104_v2, %s135_s16  ;;  %25 = vrot.lane.b32.xlu1 %v106_v3, %s136_s17  ;;  %s141_s7 = smov 56   ;;  %s142_s8 = smov 48   ;;  %v113_v11 = vld [vmem:[%s209_s0 + $0x5] sm:$0x1]   ;;  %v114_v12 = vld [vmem:[%s209_s0 + $0x4] sm:$0x1]  }
   0x7   :  { %s143_s13 = smov 40   ;;  %s144_s14 = smov 32   ;;  %v115_v13 = vld [vmem:[%s209_s0 + $0x3] sm:$0x1]   ;;  %v116_v14 = vld [vmem:[%s209_s0 + $0x2] sm:$0x1]  }
   0x8   :  { %s145_s19 = smov 24   ;;  %s146_s20 = smov 16   ;;  %v117_v15 = vld [vmem:[%s209_s0 + $0x1] sm:$0x1]   ;;  %vm27_vm4 = vcmask 851712   ;;  %vm33_vm5 = vcmask 786112  }
   0x9   :  { %s147_s0 = smov 8   ;;  %vm39_vm6 = vcmask 720512   ;;  %vm45_vm7 = vcmask 654912   ;;  %vm51_vm8 = vcmask 589312   ;;  %vm57_vm9 = vcmask 523712  }
   0xa   :  { %31 = vrot.lane.b32.xlu0 %v107_v4, %s137_s24  ;;  %37 = vrot.lane.b32.xlu1 %v108_v5, %s138_s25  ;;  %vm63_vm10 = vcmask 458112   ;;  %vm69_vm11 = vcmask 392512   ;;  %vm75_vm12 = vcmask 326912   ;;  %vm81_vm13 = vcmask 261312  }
   0xb   :  { %vm87_vm14 = vcmask 195712   ;;  %vm93_vm15 = vcmask 130112  }
   0xe   :  { %43 = vrot.lane.b32.xlu0 %v109_v7, %s139_s30  ;;  %49 = vrot.lane.b32.xlu1 %v110_v8, %s140_s2 }
  0x12   :  { %55 = vrot.lane.b32.xlu0 %v111_v9, %s141_s7  ;;  %61 = vrot.lane.b32.xlu1 %v112_v10, %s142_s8 }
  0x16   :  { %67 = vrot.lane.b32.xlu0 %v113_v11, %s143_s13  ;;  %73 = vrot.lane.b32.xlu1 %v114_v12, %s144_s14 }
  0x1a   :  { %79 = vrot.lane.b32.xlu0 %v115_v13, %s145_s19  ;;  %85 = vrot.lane.b32.xlu1 %v116_v14, %s146_s20 }
  0x1e   :  { %91 = vrot.lane.b32.xlu0 %v117_v15, %s147_s0 }
  0x74   :  { %v8_v16 = vpop.permute.xlu0 %7   ;;  %v20_v17 = vpop.permute.xlu1 %19  }
  0x75   :  { %10 = vst.msk [vmem:[#allocation0] sm:$0x1] %vm9_vm1, %v8_v16  }
  0x78   :  { %v14_v18 = vpop.permute.xlu0 %13   ;;  %v26_v19 = vpop.permute.xlu1 %25  }
  0x79   :  { %16 = vst.msk [vmem:[#allocation0] sm:$0x1] %vm15_vm2, %v14_v18  }
  0x7a   :  { %22 = vst.msk [vmem:[#allocation0] sm:$0x1] %vm21_vm3, %v20_v17  }
  0x7b   :  { %28 = vst.msk [vmem:[#allocation0] sm:$0x1] %vm27_vm4, %v26_v19  }
  0x7c   :  { %v32_v20 = vpop.permute.xlu0 %31   ;;  %v38_v21 = vpop.permute.xlu1 %37  }
  0x7d   :  { %34 = vst.msk [vmem:[#allocation0] sm:$0x1] %vm33_vm5, %v32_v20  }
  0x7e   :  { %40 = vst.msk [vmem:[#allocation0] sm:$0x1] %vm39_vm6, %v38_v21  }
  0x80   :  { %v44_v22 = vpop.permute.xlu0 %43   ;;  %v50_v23 = vpop.permute.xlu1 %49  }
  0x81   :  { %46 = vst.msk [vmem:[#allocation0] sm:$0x1] %vm45_vm7, %v44_v22  }
  0x82   :  { %52 = vst.msk [vmem:[#allocation0] sm:$0x1] %vm51_vm8, %v50_v23  }
  0x84   :  { %v56_v24 = vpop.permute.xlu0 %55   ;;  %v62_v25 = vpop.permute.xlu1 %61  }
  0x85   :  { %58 = vst.msk [vmem:[#allocation0] sm:$0x1] %vm57_vm9, %v56_v24  }
  0x86   :  { %64 = vst.msk [vmem:[#allocation0] sm:$0x1] %vm63_vm10, %v62_v25  }
  0x88   :  { %v68_v26 = vpop.permute.xlu0 %67   ;;  %v74_v27 = vpop.permute.xlu1 %73  }
  0x89   :  { %70 = vst.msk [vmem:[#allocation0] sm:$0x1] %vm69_vm11, %v68_v26  }
  0x8a   :  { %76 = vst.msk [vmem:[#allocation0] sm:$0x1] %vm75_vm12, %v74_v27  }
  0x8c   :  { %v80_v28 = vpop.permute.xlu0 %79   ;;  %v86_v29 = vpop.permute.xlu1 %85  }
  0x8d   :  { %82 = vst.msk [vmem:[#allocation0] sm:$0x1] %vm81_vm13, %v80_v28  }
  0x8e   :  { %88 = vst.msk [vmem:[#allocation0] sm:$0x1] %vm87_vm14, %v86_v29  }
  0x90   :  { %v92_v30 = vpop.permute.xlu0 %91  }
  0x91   :  { %94 = vst.msk [vmem:[#allocation0] sm:$0x1] %vm93_vm15, %v92_v30  }
  0x98   :  { %v99_v31 = vld [vmem:[#allocation0] sm:$0x1] }
  0x99   :  { %102 = vst [vmem:[%s210_s1] sm:$0x1] %v99_v31 }

// kernel: gradcam_hook_forward.1
= control target key start
LH: loop header
LB: loop body
LE: loop exit
PB: predicated region body
PF: predicated region fallthrough
CT: control target
= control target key end

     0   :  { %s1100_s0 = inlined_call_operand.vmem [shape: f32[2,18,72], index: 0, kind: input, shape index: {}]   ;;  %s1101_s1 = inlined_call_operand.vmem [shape: f32[3,72,128], index: 1, kind: input, shape index: {}]   ;;  %s1102_s2 = inlined_call_operand.vmem [shape: f32[1,128], index: 2, kind: input, shape index: {}]   ;;  %s1103_s3 = inlined_call_operand.vmem [shape: f32[2,32], index: 3, kind: input, shape index: {}]   ;;  %s1104_s4 = inlined_call_operand.vmem [shape: f32[128,10], index: 4, kind: input, shape index: {}]   ;;  %s1105_s5 = inlined_call_operand.vmem [shape: f32[1,10], index: 5, kind: input, shape index: {}]   ;;  %s1106_s6 = inlined_call_operand.vmem [shape: f32[32,128], index: 6, kind: output, shape index: {0}]   ;;  %s1107_s7 = inlined_call_operand.hbm [shape: f32[2,10], index: 7, kind: output, shape index: {1}]  }
   0x1   :  { %v47_v0 = vld [vmem:[%s1101_s1 + $0x40] sm:$0xff]  ;;  %v46_v1 = vld [vmem:[%s1101_s1 + $0x38] sm:$0xff]  ;;  %v597_v2 = vld [vmem:[%s1101_s1 + $0x88] sm:$0xff] }
   0x2   :  { %678 = vmatprep.subr.mxu0 %v47_v0  ;;  %702 = vmatprep.subr.mxu1 %v597_v2  ;;  %v596_v3 = vld [vmem:[%s1101_s1 + $0x80] sm:$0xff]  ;;  %v45_v4 = vld [vmem:[%s1101_s1 + $0x30] sm:$0xff]  ;;  %v595_v5 = vld [vmem:[%s1101_s1 + $0x78] sm:$0xff] }
   0x3   :  { %679 = vmatpush3.msra.mxu0 %v47_v0  ;;  %703 = vmatpush3.msra.mxu1 %v597_v2  ;;  %v44_v6 = vld [vmem:[%s1101_s1 + $0x28] sm:$0xff]  ;;  %v594_v7 = vld [vmem:[%s1101_s1 + $0x70] sm:$0xff]  ;;  %v43_v8 = vld [vmem:[%s1101_s1 + $0x20] sm:$0xff] }
   0x4   :  { %680 = vmatprep.subr.mxu0 %v46_v1  ;;  %704 = vmatprep.subr.mxu1 %v596_v3  ;;  %v593_v9 = vld [vmem:[%s1101_s1 + $0x68] sm:$0xff]  ;;  %v42_v10 = vld [vmem:[%s1101_s1 + $0x18] sm:$0xff]  ;;  %v592_v11 = vld [vmem:[%s1101_s1 + $0x60] sm:$0xff] }
   0x5   :  { %681 = vmatpush3.msra.mxu0 %v46_v1  ;;  %705 = vmatpush3.msra.mxu1 %v596_v3  ;;  %v41_v12 = vld [vmem:[%s1101_s1 + $0x10] sm:$0xff]  ;;  %v591_v13 = vld [vmem:[%s1101_s1 + $0x58] sm:$0xff]  ;;  %v26_v14 = vld [vmem:[%s1100_s0] sm:$0xff] }
   0x6   :  { %682 = vmatprep.subr.mxu0 %v45_v4  ;;  %706 = vmatprep.subr.mxu1 %v595_v5  ;;  %v912_v15 = vld [vmem:[%s1100_s0 + $0x8] sm:$0xff]  ;;  %v917_v16 = vld [vmem:[%s1100_s0 + $0x10] sm:$0x3] }
   0x7   :  { %683 = vmatpush3.msra.mxu0 %v45_v4  ;;  %707 = vmatpush3.msra.mxu1 %v595_v5  ;;  %v40_v17 = vld [vmem:[%s1101_s1 + $0x8] sm:$0xff]  ;;  %v590_v18 = vld [vmem:[%s1101_s1 + $0x50] sm:$0xff] }
   0x8   :  { %684 = vmatprep.subr.mxu0 %v44_v6  ;;  %708 = vmatprep.subr.mxu1 %v594_v7 }
   0x9   :  { %685 = vmatpush3.msra.mxu0 %v44_v6  ;;  %709 = vmatpush3.msra.mxu1 %v594_v7 }
   0xa   :  { %686 = vmatprep.subr.mxu0 %v43_v8  ;;  %710 = vmatprep.subr.mxu1 %v593_v9 }
   0xb   :  { %687 = vmatpush3.msra.mxu0 %v43_v8  ;;  %711 = vmatpush3.msra.mxu1 %v593_v9 }
   0xc   :  { %688 = vmatprep.subr.mxu0 %v42_v10  ;;  %712 = vmatprep.subr.mxu1 %v592_v11 }
   0xd   :  { %689 = vmatpush3.msra.mxu0 %v42_v10  ;;  %713 = vmatpush3.msra.mxu1 %v592_v11 }
   0xe   :  { %13 = vsyncpa [#allocation3], 0  ;;  %690 = vmatprep.subr.mxu0 %v41_v12  ;;  %714 = vmatprep.subr.mxu1 %v591_v13  ;;  %vm48_vm0 = vcmask 588800   ;;  %v153_v19 = vrot.slane %v26_v14, 1  ;;  %v154_v20 = vrot.slane %v912_v15, 1  ;;  %v929_v21 = vld [vmem:[%s1100_s0 + $0x18] sm:$0xff] }
   0xf   :  { %v934_v22 = vld [vmem:[%s1100_s0 + $0x20] sm:$0xff]  ;;  %691 = vmatpush3.msra.mxu0 %v41_v12  ;;  %715 = vmatpush3.msra.mxu1 %v591_v13  ;;  %vm152_vm1 = vcmask 1046528   ;;  %v156_v24 = vrot.slane %v917_v16, 1  ;;  %v589_v25 = vld [vmem:[%s1101_s1 + $0x48] sm:$0xff]  ;;  %v610_v27 = vld [vmem:[%s1101_s1 + $0xd0] sm:$0xff]  ;;  %v158_v28 = vrot.slane %v929_v21, 1 }
  0x10   :  { %v39_v23 = vld [vmem:[%s1101_s1] sm:$0xff]  ;;  %692 = vmatprep.subr.mxu0 %v40_v17  ;;  %716 = vmatprep.subr.mxu1 %v590_v18  ;;  %v946_v26 = vld [vmem:[%s1100_s0 + $0x28] sm:$0x3]  ;;  %v159_v29 = vrot.slane %v934_v22, 1  ;;  %v155_v30 = vsel %vm152_vm1, %v153_v19, %v154_v20  ;;  %v271_v33 = vrot.slane %v26_v14, 2  ;;  %v272_v34 = vrot.slane %v912_v15, 2 }
  0x11   :  { %693 = vmatpush3.msra.mxu0 %v40_v17  ;;  %696 = vmatprep.mubr.msk.f32.mxu0 %vm48_vm0, %v26_v14  ;;  %v157_v31 = vsel %vm152_vm1, %v154_v20, %v156_v24  ;;  %v161_v32 = vrot.slane %v946_v26, 1  ;;  %v609_v35 = vld [vmem:[%s1101_s1 + $0xc8] sm:$0xff]  ;;  %vm270_vm2 = vcmask 1045504   ;;  %v608_v37 = vld [vmem:[%s1101_s1 + $0xc0] sm:$0xff]  ;;  %v607_v39 = vld [vmem:[%s1101_s1 + $0xb8] sm:$0xff]  ;;  %v274_v44 = vrot.slane %v917_v16, 2 }
  0x12   :  { %694 = vmatprep.subr.mxu0 %v39_v23  ;;  %717 = vmatpush3.msra.mxu1 %v590_v18  ;;  %v160_v36 = vsel %vm152_vm1, %v158_v28, %v159_v29  ;;  %v273_v40 = vsel %vm270_vm2, %v271_v33, %v272_v34  ;;  %v606_v41 = vld [vmem:[%s1101_s1 + $0xb0] sm:$0xff]  ;;  %v605_v42 = vld [vmem:[%s1101_s1 + $0xa8] sm:$0xff]  ;;  %v604_v43 = vld [vmem:[%s1101_s1 + $0xa0] sm:$0xff]  ;;  %v276_v46 = vrot.slane %v929_v21, 2  ;;  %v277_v47 = vrot.slane %v934_v22, 2  ;;  %s823_s14 = smov [#allocation2]  }
  0x13   :  { %695 = vmatpush3.msra.mxu0 %v39_v23  ;;  %718 = vmatprep.subr.mxu1 %v589_v25  ;;  %v162_v38 = vsel %vm152_vm1, %v159_v29, %v161_v32  ;;  %v603_v45 = vld [vmem:[%s1101_s1 + $0x98] sm:$0xff]  ;;  %v602_v48 = vld [vmem:[%s1101_s1 + $0x90] sm:$0xff]  ;;  %v275_v49 = vsel %vm270_vm2, %v272_v34, %v274_v44  ;;  %v279_v50 = vrot.slane %v946_v26, 2  ;;  %v821_v53 = vmov 0.0   ;;  %v484_v56 = vld [vmem:[%s1104_s4 + $0x68] sm:$0xff]  ;;  %s574_s15 = sshll.u32 %s823_s14, 4  ;;  %s575_s15 = int_to_ptr.vmem [resolvable:$true] %s574_s15 }
  0x14   :  { %697 = vmatmul.mubr.msk.f32.vlgmr.msra.gmra.mxu0 %vm48_vm0, %v912_v15  ;;  %726 = vmatprep.subr.mxu0 %v610_v27  ;;  %v278_v51 = vsel %vm270_vm2, %v276_v46, %v277_v47  ;;  %vm822_vm3 = vmmov 0   ;;  %v486_v54 = vld [vmem:[%s1104_s4 + $0x78] sm:$0xff]  ;;  %v485_v55 = vld [vmem:[%s1104_s4 + $0x70] sm:$0xff]  ;;  %v483_v57 = vld [vmem:[%s1104_s4 + $0x60] sm:$0xff]  ;;  %vm397_vm4 = vcmask 261120   ;;  %vm564_vm5 = vcmask 74752   ;;  %p804_p1 = scmp.lt.s32.totalorder %s575_s15, %s575_s15 }
  0x15   :  { %719 = vmatpush3.msra.mxu1 %v589_v25  ;;  %720 = vmatprep.mubr.msk.f32.mxu1 %vm48_vm0, %v155_v30  ;;  %v280_v52 = vsel %vm270_vm2, %v277_v47, %v279_v50  ;;  %v482_v58 = vld [vmem:[%s1104_s4 + $0x58] sm:$0xff]  ;;  %v481_v59 = vld [vmem:[%s1104_s4 + $0x50] sm:$0xff]  ;;  %v480_v60 = vld [vmem:[%s1104_s4 + $0x48] sm:$0xff] }
  0x16   :  { %727 = vmatpush3.msra.mxu0 %v610_v27  ;;  %721 = vmatmul.mubr.msk.f32.vlgmr.msra.gmra.mxu1 %vm48_vm0, %v157_v31  ;;  %v479_v61 = vld [vmem:[%s1104_s4 + $0x40] sm:$0xff]  ;;  %v478_v62 = vld [vmem:[%s1104_s4 + $0x38] sm:$0xff]  ;;  %v477_v63 = vld [vmem:[%s1104_s4 + $0x30] sm:$0xff] }
  0x17   :  { %728 = vmatprep.subr.mxu0 %v609_v35  ;;  %699 = vmatprep.mubr.msk.f32.mxu0 %vm48_vm0, %v929_v21  ;;  %v476_v0 = vld [vmem:[%s1104_s4 + $0x28] sm:$0xff]  ;;  %v475_v1 = vld [vmem:[%s1104_s4 + $0x20] sm:$0xff]  ;;  %v474_v2 = vld [vmem:[%s1104_s4 + $0x18] sm:$0xff] }
  0x18   :  { %729 = vmatpush3.msra.mxu0 %v609_v35  ;;  %723 = vmatprep.mubr.msk.f32.mxu1 %vm48_vm0, %v160_v36  ;;  %v473_v3 = vld [vmem:[%s1104_s4 + $0x10] sm:$0xff]  ;;  %v472_v4 = vld [vmem:[%s1104_s4 + $0x8] sm:$0xff]  ;;  %v584_v6 = vld [vmem:[%s1102_s2] ss:$0 sm:$0xff] }
  0x19   :  { %730 = vmatprep.subr.mxu0 %v608_v37  ;;  %700 = vmatmul.mubr.msk.f32.gmra.mxu0 %vm48_vm0, %v934_v22  ;;  %v396_v34 = vld [vmem:[%s1103_s3] sm:$0x3]  ;;  %s799_s3 = scalar_lea.vmem %s575_s15, 32 }
  0x1a   :  { %731 = vmatpush3.msra.mxu0 %v608_v37  ;;  %724 = vmatmul.mubr.msk.f32.gmra.mxu1 %vm48_vm0, %v162_v38  ;;  %v471_v35 = vld [vmem:[%s1104_s4] sm:$0xff]  ;;  %p800_p0 = scmp.ne.s32.totalorder %s575_s15, %s799_s3  ;;  %p805_p2 = scmp.lt.s32.totalorder %s799_s3, %s799_s3 }
  0x1b   :  { %732 = vmatprep.subr.mxu0 %v607_v39  ;;  %744 = vmatprep.mubr.msk.f32.mxu0 %vm48_vm0, %v273_v40  ;;  %v616_v38 = vld [vmem:[%s1105_s5] ss:$0 sm:$0xff] }
  0x1c   :  { %733 = vmatpush3.msra.mxu0 %v607_v39  ;;  %761 = vmatprep.subr.mxu1 %v821_v53  ;;  %p806_p3 = por %p805_p2, %p804_p1 }
  0x1d   :  { %734 = vmatprep.subr.mxu0 %v606_v41  ;;  %793 = vmatprep.mubr.msk.f32.mxu1 %vm822_vm3, %v821_v53 }
  0x1e   :  { %735 = vmatpush3.msra.mxu0 %v606_v41  ;;  %762 = vmatpush3.msra.mxu1 %v486_v54  ;;  %p807_p4 = pnand %p806_p3, %p800_p0 }
  0x1f   :  { %736 = vmatprep.subr.mxu0 %v605_v42  ;;  %763 = vmatprep.subr.mxu1 %v821_v53 }
  0x20   :  { %737 = vmatpush3.msra.mxu0 %v605_v42  ;;  %764 = vmatpush3.msra.mxu1 %v485_v55 }
  0x21   :  { %738 = vmatprep.subr.mxu0 %v604_v43  ;;  %765 = vmatprep.subr.mxu1 %v821_v53 }
  0x22   :  { %739 = vmatpush3.msra.mxu0 %v604_v43  ;;  %766 = vmatpush3.msra.mxu1 %v484_v56 }
  0x23   :  { %740 = vmatprep.subr.mxu0 %v603_v45  ;;  %767 = vmatprep.subr.mxu1 %v821_v53 }
  0x24   :  { %741 = vmatpush3.msra.mxu0 %v603_v45  ;;  %768 = vmatpush3.msra.mxu1 %v483_v57 }
  0x25   :  { %742 = vmatprep.subr.mxu0 %v602_v48  ;;  %769 = vmatprep.subr.mxu1 %v821_v53 }
  0x26   :  { %743 = vmatpush3.msra.mxu0 %v602_v48  ;;  %770 = vmatpush3.msra.mxu1 %v482_v58 }
  0x27   :  { %745 = vmatmul.mubr.msk.f32.vlgmr.msra.gmra.mxu0 %vm48_vm0, %v275_v49  ;;  %750 = vmatprep.subr.mxu0 %v821_v53 }
  0x28   :  { %747 = vmatprep.mubr.msk.f32.mxu0 %vm48_vm0, %v278_v51  ;;  %771 = vmatprep.subr.mxu1 %v821_v53 }
  0x29   :  { %772 = vmatpush3.msra.mxu1 %v481_v59 }
  0x2a   :  { %773 = vmatprep.subr.mxu1 %v821_v53 }
  0x2b   :  { %748 = vmatmul.mubr.msk.f32.gmra.mxu0 %vm48_vm0, %v280_v52  ;;  %774 = vmatpush3.msra.mxu1 %v480_v60 }
  0x2c   :  { %758 = vmatprep.mubr.msk.f32.mxu0 %vm822_vm3, %v821_v53  ;;  %775 = vmatprep.subr.mxu1 %v821_v53 }
  0x2d   :  { %776 = vmatpush3.msra.mxu1 %v479_v61 }
  0x2e   :  { %777 = vmatprep.subr.mxu1 %v821_v53 }
  0x2f   :  { %778 = vmatpush3.msra.mxu1 %v478_v62 }
  0x30   :  { %779 = vmatprep.subr.mxu1 %v821_v53 }
  0x31   :  { %780 = vmatpush3.msra.mxu1 %v477_v63 }
  0x32   :  { %781 = vmatprep.subr.mxu1 %v821_v53 }
  0x33   :  { %782 = vmatpush3.msra.mxu1 %v476_v0 }
  0x34   :  { %783 = vmatprep.subr.mxu1 %v821_v53 }
  0x35   :  { %784 = vmatpush3.msra.mxu1 %v475_v1 }
  0x36   :  { %785 = vmatprep.subr.mxu1 %v821_v53 }
  0x37   :  { %786 = vmatpush3.msra.mxu1 %v474_v2 }
  0x38   :  { %787 = vmatprep.subr.mxu1 %v821_v53 }
  0x39   :  { %788 = vmatpush3.msra.mxu1 %v473_v3 }
  0x3a   :  { %789 = vmatprep.subr.mxu1 %v821_v53 }
  0x3b   :  { %790 = vmatpush3.msra.mxu1 %v472_v4 }
  0x3c   :  { %791 = vmatprep.subr.mxu1 %v821_v53 }
  0x3d   :  { %792 = vmatpush3.msra.mxu1 %v471_v35 }
  0xd4   :  { %v698_v5 = vpop.f32.mrf.mxu0 }
  0xd5   :  { %v147_v10 = vadd.f32 %v698_v5, %v584_v6 }
  0xd6   :  { %v127_v7 = vpop.f32.mrf.mxu0  ;;  %v722_v8 = vpop.f32.mrf.mxu1 }
  0xd7   :  { %v146_v12 = vadd.f32 %v584_v6, %v127_v7  ;;  %v267_v15 = vadd.f32 %v722_v8, %v147_v10 }
  0xd8   :  { %v247_v11 = vpop.f32.mrf.mxu1 }
  0xd9   :  { %v701_v9 = vpop.f32.mrf.mxu0  ;;  %v266_v18 = vadd.f32 %v247_v11, %v146_v12 }
  0xda   :  { %v725_v14 = vpop.f32.mrf.mxu1  ;;  %v149_v16 = vadd.f32 %v701_v9, %v584_v6 }
  0xdb   :  { %v137_v13 = vpop.f32.mrf.mxu0 }
  0xdc   :  { %v148_v19 = vadd.f32 %v584_v6, %v137_v13  ;;  %v257_v21 = vpop.f32.mrf.mxu1  ;;  %v269_v23 = vadd.f32 %v725_v14, %v149_v16 }
  0xde   :  { %v268_v27 = vadd.f32 %v257_v21, %v148_v19 }
  0xe7   :  { %v746_v17 = vpop.f32.mrf.mxu0 }
  0xe8   :  { %v385_v20 = vadd.f32 %v746_v17, %v267_v15 }
  0xe9   :  { %v365_v22 = vpop.f32.mrf.mxu0 }
  0xea   :  { %v389_v24 = vmax.f32 %v385_v20, 0.0  ;;  %v384_v25 = vadd.f32 %v365_v22, %v266_v18 }
  0xeb   :  { %v749_v26 = vpop.f32.mrf.mxu0 }
  0xec   :  { %393 = vst [vmem:[%s1106_s6 + $0x8] sm:$0xff] %v389_v24  ;;  %v388_v28 = vmax.f32 %v384_v25, 0.0  ;;  %v387_v29 = vadd.f32 %v749_v26, %v269_v23 }
  0xed   :  { %v375_v30 = vpop.f32.mrf.mxu0 }
  0xee   :  { %392 = vst [vmem:[%s1106_s6] sm:$0xff] %v388_v28  ;;  %v391_v31 = vmax.f32 %v387_v29, 0.0  ;;  %v386_v32 = vadd.f32 %v375_v30, %v268_v27 }
  0xf0   :  { %395 = vst [vmem:[%s1106_s6 + $0x18] sm:$0xff] %v391_v31  ;;  %v390_v33 = vmax.f32 %v386_v32, 0.0  ;;  %751 = vmatpush3.msra.mxu0 %v391_v31 }
  0xf1   :  { %752 = vmatprep.subr.mxu0 %v821_v53 }
  0xf2   :  { %394 = vst [vmem:[%s1106_s6 + $0x10] sm:$0xff] %v390_v33  ;;  %753 = vmatpush3.msra.mxu0 %v390_v33 }
  0xf3   :  { %754 = vmatprep.subr.mxu0 %v821_v53 }
  0xf4   :  { %755 = vmatpush3.msra.mxu0 %v389_v24 }
  0xf5   :  { %756 = vmatprep.subr.mxu0 %v821_v53 }
  0xf6   :  { %757 = vmatpush3.msra.mxu0 %v388_v28 }
  0xf7   :  { %759 = vmatmul.mubr.msk.f32.vlgmr.msra.gmra.mxu0 %vm397_vm4, %v396_v34 }
 0x1b7   :  { %v467_v36 = vpop.f32.mrf.mxu0 }
 0x1b8   :  { %794 = vmatmul.mubr.f32.vlgmr.msra.gmra.mxu1 %v467_v36 }
 0x1b9   :  { %v760_v37 = vpop.f32.mrf.mxu0 }
 0x278   :  { %v560_v39 = vpop.f32.mrf.mxu1 }
 0x279   :  { %v561_v40 = vadd.f32 %v616_v38, %v560_v39 }
 0x27a   :  { %v795_v41 = vpop.f32.mrf.mxu1 }
 0x27b   :  { %565 = vst.msk [vmem:[#allocation2] sm:$0x3] %vm564_vm5, %v561_v40 }
 0x27c   :  { %810 = shalt.err (!%p807_p4)
}
 0x27d   :  { %577 = dma.vmem_to_hbm [thread:$0]  %s575_s15, 32, %s1107_s7, [#allocation3]  }
 0x27e   :  { %819 = dma.done.wait [#allocation3], 32  }
 0x27f   :  { %820 = vsyncadd [#allocation3], 4294967264 }
 0x280   :  { %583 = vsyncpa [#allocation3], 1 }

</bundles_post_ra>
